<compile_context>
chip_gen: v6e
topology: v6e:2x2x1
jax: 0.10.0
libtpu: 0.0.40
codegen_flags: <defaults>
</compile_context>

<pallas_src>
import functools

import jax
import jax.numpy as jnp
from jax.experimental import pallas as pl
from jax.experimental.pallas import tpu as pltpu

IMAGE_Y = 16
IMAGE_X = 16
NB_CHANNELS = 4
MODEL_COMPLEXITY = 1
LEAK = 0.2
DROP_P = 0.3

IN_DIM = IMAGE_Y * IMAGE_X * NB_CHANNELS            # 1024
H1 = 32 * MODEL_COMPLEXITY * NB_CHANNELS            # 128
H2 = 16 * MODEL_COMPLEXITY * NB_CHANNELS            # 64
H3 = 8 * MODEL_COMPLEXITY * NB_CHANNELS             # 32
OUT_DIM = 1

MAX_TILE_B = 2048                   # f32 x tile = 8 MiB; 2 buffers + weights + scratch < 48 MiB
VMEM_LIMIT_BYTES = 48 * 1024 * 1024  # < physical VMEM on v5e/v6e (128 MiB) and v7x (64 MiB/TC)


def _round_up(x, m):
    return (x + m - 1) // m * m


def _leaky_relu(x):
    return jnp.where(x >= 0, x, LEAK * x)


def _keep_mask(shape, row0_u, seed_u, salt):
    """Counter-based Bernoulli(1-p) keep mask keyed on (seed, global row, col, layer)."""
    # TODO(synk): statistically-equivalent hash PRNG; does not replay torch's dropout RNG stream.
    r = jax.lax.broadcasted_iota(jnp.int32, shape, 0).astype(jnp.uint32)
    c = jax.lax.broadcasted_iota(jnp.int32, shape, 1).astype(jnp.uint32)
    base = (row0_u * jnp.uint32(0x9E3779B1)
            + seed_u * jnp.uint32(0xC2B2AE3D)
            + jnp.uint32(salt))                      # scalar work, folded once per layer
    h = r * jnp.uint32(0x9E3779B1) + c * jnp.uint32(0x85EBCA77) + base
    # single xorshift-multiply-xorshift round: plenty of mixing for dropout
    h = h ^ (h >> 16)
    h = h * jnp.uint32(0x7FEB352D)
    h = h ^ (h >> 15)
    # integer threshold compare on the top 31 bits -- no float converts, no float compare
    thresh = jnp.int32(int((1.0 - DROP_P) * (1 << 31)))
    return (h >> 1).astype(jnp.int32) < thresh


def d_kernel(seed_ref,
             x_ref,
             w1_ref, b1_ref, w2_ref, b2_ref, w3_ref, b3_ref, w4_ref, b4_ref,
             o_ref, *, training):
    tile_b = x_ref.shape[0]

    if training:
        seed_u = seed_ref[0].astype(jnp.uint32)
        row0_u = (pl.program_id(0) * tile_b).astype(jnp.uint32)   # per-tile / per-core offset
        inv_keep = 1.0 / (1.0 - DROP_P)

        def dropout(h, salt):
            keep = _keep_mask(h.shape, row0_u, seed_u, salt)
            return jnp.where(keep, h * inv_keep, 0.0)
    else:
        def dropout(h, salt):
            return h

    # f32 -> bf16 cast happens here on the VPU (no separate HBM pass for a bf16 copy of x).
    x = x_ref[...].astype(jnp.bfloat16)                            # (tile_b, 1024)

    h = jnp.dot(x, w1_ref[...], preferred_element_type=jnp.float32) + b1_ref[...]
    h = dropout(_leaky_relu(h), 0x11)

    h = jnp.dot(h.astype(jnp.bfloat16), w2_ref[...],
                preferred_element_type=jnp.float32) + b2_ref[...]
    h = dropout(_leaky_relu(h), 0x22)

    h = jnp.dot(h.astype(jnp.bfloat16), w3_ref[...],
                preferred_element_type=jnp.float32) + b3_ref[...]
    h = dropout(_leaky_relu(h), 0x33)

    # fc4: (tile_b,32)@(32,1) as a VPU multiply + sublane reduce in transposed orientation,
    # so the output block is lane-dense (1, tile_b) -> unmasked vector stores.
    t = jnp.transpose(h * w4_ref[...])                             # (32, tile_b) f32, XLU
    z = jnp.sum(t, axis=0, keepdims=True) + b4_ref[...]            # (1, tile_b)
    o_ref[...] = jax.nn.sigmoid(z).reshape(1, 1, tile_b)


@functools.partial(jax.jit, static_argnames=("training",))
def discriminator_forward(seed, x, params, training=True):
    (w1, b1), (w2, b2), (w3, b3), (w4, b4) = params
    batch = x.shape[0]

    # Keep x in f32: the collapse-reshape is free; the bf16 cast happens inside the kernel.
    x2 = x.reshape(batch, IN_DIM)

    # Tile selection: balanced tiles (pad < 1 tile) and >=2 grid steps for large batches
    # so "parallel" batch sharding keeps both v7x TensorCores busy.
    n_tiles = pl.cdiv(batch, MAX_TILE_B)
    if batch >= 512:
        n_tiles = max(n_tiles, 2)
    if n_tiles > 1:
        n_tiles = _round_up(n_tiles, 2)            # even split across 2 TCs on v7x
    tile_b = _round_up(pl.cdiv(batch, n_tiles), 16)
    n_tiles = pl.cdiv(batch, tile_b)
    b_pad = n_tiles * tile_b
    if b_pad != batch:
        x2 = jnp.pad(x2, ((0, b_pad - batch), (0, 0)))

    w1b = w1.astype(jnp.bfloat16)
    w2b = w2.astype(jnp.bfloat16)
    w3b = w3.astype(jnp.bfloat16)
    w4_row = w4.reshape(1, H3).astype(jnp.float32)     # fc4 weight as a lane row
    b1r = b1.reshape(1, H1).astype(jnp.float32)
    b2r = b2.reshape(1, H2).astype(jnp.float32)
    b3r = b3.reshape(1, H3).astype(jnp.float32)
    b4r = b4.reshape(1, OUT_DIM).astype(jnp.float32)

    const = lambda i, s: (0, 0)                        # weights stay VMEM-resident across steps
    grid = (n_tiles,)

    flops = 2 * b_pad * (IN_DIM * H1 + H1 * H2 + H2 * H3 + H3 * OUT_DIM)
    bytes_accessed = (x2.size * 4
                      + (w1b.size + w2b.size + w3b.size) * 2
                      + (b1r.size + b2r.size + b3r.size + w4_row.size + b4r.size) * 4
                      + b_pad * OUT_DIM * 4)

    out = pl.pallas_call(
        functools.partial(d_kernel, training=training),
        out_shape=jax.ShapeDtypeStruct((n_tiles, 1, tile_b), jnp.float32),
        grid_spec=pltpu.PrefetchScalarGridSpec(
            num_scalar_prefetch=1,                     # seed -> SMEM
            grid=grid,
            in_specs=[
                pl.BlockSpec((tile_b, IN_DIM), lambda i, s: (i, 0)),   # streamed f32 x
                pl.BlockSpec((IN_DIM, H1), const),
                pl.BlockSpec((1, H1), const),
                pl.BlockSpec((H1, H2), const),
                pl.BlockSpec((1, H2), const),
                pl.BlockSpec((H2, H3), const),
                pl.BlockSpec((1, H3), const),
                pl.BlockSpec((1, H3), const),                          # w4 row
                pl.BlockSpec((1, OUT_DIM), const),
            ],
            out_specs=pl.BlockSpec((1, 1, tile_b), lambda i, s: (i, 0, 0)),  # lane-dense output
        ),
        compiler_params=pltpu.CompilerParams(
            dimension_semantics=("parallel",),         # shards batch tiles across TCs on v7x
            vmem_limit_bytes=VMEM_LIMIT_BYTES,
        ),
        cost_estimate=pl.CostEstimate(flops=flops,
                                      transcendentals=b_pad,
                                      bytes_accessed=bytes_accessed),
    )(seed, x2, w1b, b1r, w2b, b2r, w3b, b3r, w4_row, b4r)

    return out.reshape(b_pad, OUT_DIM)[:batch]


def init_linear(key, fan_in, fan_out):
    # Mimic torch.nn.Linear default init: U(-1/sqrt(fan_in), 1/sqrt(fan_in)).
    kw, kb = jax.random.split(key)
    bound = 1.0 / jnp.sqrt(fan_in)
    w = jax.random.uniform(kw, (fan_in, fan_out), jnp.float32, -bound, bound)
    b = jax.random.uniform(kb, (1, fan_out), jnp.float32, -bound, bound)
    return w, b


if __name__ == "__main__":
    key = jax.random.PRNGKey(0)
    k_x, k1, k2, k3, k4 = jax.random.split(key, 5)

    batch = 2
    x = jax.random.normal(k_x, (batch, NB_CHANNELS, IMAGE_Y, IMAGE_X), jnp.float32)

    params = (
        init_linear(k1, IN_DIM, H1),
        init_linear(k2, H1, H2),
        init_linear(k3, H2, H3),
        init_linear(k4, H3, OUT_DIM),
    )

    seed = jnp.array([1234], dtype=jnp.int32)

    # Training mode (matches F.dropout(out, 0.3), which is always "training" in the reference).
    out = discriminator_forward(seed, x, params)
    out = jax.block_until_ready(out)
    assert out.shape == (batch, OUT_DIM)
    assert bool(jnp.all((out >= 0.0) & (out <= 1.0)))
    assert bool(jnp.all(jnp.isfinite(out)))

    # Eval mode (dropout = identity).
    out_eval = discriminator_forward(seed, x, params, training=False)
    out_eval = jax.block_until_ready(out_eval)
    assert out_eval.shape == (batch, OUT_DIM)
    assert bool(jnp.all((out_eval >= 0.0) & (out_eval <= 1.0)))
    assert bool(jnp.all(jnp.isfinite(out_eval)))

    print("KERNEL_OK")
</pallas_src>

<mosaic_0001>
module attributes {stable_mosaic.version = 11 : i64} {
  func.func @d_kernel(%arg0: i32, %arg1: memref<1xi32, #tpu.memory_space<smem>>, %arg2: memref<16x1024xf32, #tpu.memory_space<vmem>>, %arg3: memref<1024x128xbf16, #tpu.memory_space<vmem>>, %arg4: memref<1x128xf32, #tpu.memory_space<vmem>>, %arg5: memref<128x64xbf16, #tpu.memory_space<vmem>>, %arg6: memref<1x64xf32, #tpu.memory_space<vmem>>, %arg7: memref<64x32xbf16, #tpu.memory_space<vmem>>, %arg8: memref<1x32xf32, #tpu.memory_space<vmem>>, %arg9: memref<1x32xf32, #tpu.memory_space<vmem>>, %arg10: memref<1x1xf32, #tpu.memory_space<vmem>>, %arg11: memref<1x1x16xf32, #tpu.memory_space<vmem>>) attributes {dimension_semantics = [#tpu.dimension_semantics<parallel>], iteration_bounds = array<i64: 1>, scalar_prefetch = 1 : i64, scratch_operands = 0 : i64, tpu.core_type = #tpu.core_type<tc>, window_params = [{transform_indices = @transform_0, window_bounds = array<i64: 16, 1024>}, {pipeline_mode = #tpu.pipeline_mode<synchronous>, transform_indices = @transform_1, window_bounds = array<i64: 1024, 128>}, {pipeline_mode = #tpu.pipeline_mode<synchronous>, transform_indices = @transform_2, window_bounds = array<i64: 1, 128>}, {pipeline_mode = #tpu.pipeline_mode<synchronous>, transform_indices = @transform_3, window_bounds = array<i64: 128, 64>}, {pipeline_mode = #tpu.pipeline_mode<synchronous>, transform_indices = @transform_4, window_bounds = array<i64: 1, 64>}, {pipeline_mode = #tpu.pipeline_mode<synchronous>, transform_indices = @transform_5, window_bounds = array<i64: 64, 32>}, {pipeline_mode = #tpu.pipeline_mode<synchronous>, transform_indices = @transform_6, window_bounds = array<i64: 1, 32>}, {pipeline_mode = #tpu.pipeline_mode<synchronous>, transform_indices = @transform_7, window_bounds = array<i64: 1, 32>}, {pipeline_mode = #tpu.pipeline_mode<synchronous>, transform_indices = @transform_8, window_bounds = array<i64: 1, 1>}, {transform_indices = @transform_9, window_bounds = array<i64: 1, 1, 16>}]} {
    %c0 = arith.constant 0 : index
    %0 = memref.load %arg1[%c0] : memref<1xi32, #tpu.memory_space<smem>>
    %c16_i32 = arith.constant 16 : i32
    %1 = arith.muli %arg0, %c16_i32 : i32
    %c0_0 = arith.constant 0 : index
    %c0_1 = arith.constant 0 : index
    %2 = vector.load %arg2[%c0_0, %c0_1] : memref<16x1024xf32, #tpu.memory_space<vmem>>, vector<16x1024xf32>
    %3 = arith.truncf %2 : vector<16x1024xf32> to vector<16x1024xbf16>
    %c0_2 = arith.constant 0 : index
    %c0_3 = arith.constant 0 : index
    %4 = vector.load %arg3[%c0_2, %c0_3] : memref<1024x128xbf16, #tpu.memory_space<vmem>>, vector<1024x128xbf16>
    %cst = arith.constant dense<0.000000e+00> : vector<16x128xf32>
    %5 = tpu.matmul %3, %4, %cst {dimension_numbers = #tpu.dot_dimension_numbers<[1], [0], [0], [1], [0, 0, 1, 1], [], []>} : vector<16x1024xbf16>, vector<1024x128xbf16>, vector<16x128xf32> -> vector<16x128xf32>
    %c0_4 = arith.constant 0 : index
    %c0_5 = arith.constant 0 : index
    %6 = vector.load %arg4[%c0_4, %c0_5] : memref<1x128xf32, #tpu.memory_space<vmem>>, vector<1x128xf32>
    %7 = vector.broadcast %6 : vector<1x128xf32> to vector<16x128xf32>
    %8 = arith.addf %5, %7 : vector<16x128xf32>
    %cst_6 = arith.constant 0.000000e+00 : f32
    %9 = vector.broadcast %cst_6 : f32 to vector<16x128xf32>
    %10 = arith.cmpf oge, %8, %9 : vector<16x128xf32>
    %cst_7 = arith.constant 2.000000e-01 : f32
    %11 = vector.broadcast %cst_7 : f32 to vector<16x128xf32>
    %12 = arith.mulf %11, %8 : vector<16x128xf32>
    %13 = arith.select %10, %8, %12 : vector<16x128xi1>, vector<16x128xf32>
    %14 = tpu.iota {dimensions = array<i32: 0>} : vector<16x128xi32>
    %15 = tpu.iota {dimensions = array<i32: 1>} : vector<16x128xi32>
    %c-1640531535_i32 = arith.constant -1640531535 : i32
    %16 = arith.muli %1, %c-1640531535_i32 : i32
    %c-1028477379_i32 = arith.constant -1028477379 : i32
    %17 = arith.muli %0, %c-1028477379_i32 : i32
    %18 = arith.addi %16, %17 : i32
    %c17_i32 = arith.constant 17 : i32
    %19 = arith.addi %18, %c17_i32 : i32
    %c-1640531535_i32_8 = arith.constant -1640531535 : i32
    %20 = vector.broadcast %c-1640531535_i32_8 : i32 to vector<16x128xi32>
    %21 = arith.muli %14, %20 : vector<16x128xi32>
    %c-2048144777_i32 = arith.constant -2048144777 : i32
    %22 = vector.broadcast %c-2048144777_i32 : i32 to vector<16x128xi32>
    %23 = arith.muli %15, %22 : vector<16x128xi32>
    %24 = arith.addi %21, %23 : vector<16x128xi32>
    %25 = vector.broadcast %19 : i32 to vector<16x128xi32>
    %26 = arith.addi %24, %25 : vector<16x128xi32>
    %c16_i32_9 = arith.constant 16 : i32
    %27 = vector.broadcast %c16_i32_9 : i32 to vector<16x128xi32>
    %28 = arith.shrui %26, %27 : vector<16x128xi32>
    %29 = arith.xori %26, %28 : vector<16x128xi32>
    %c2146121005_i32 = arith.constant 2146121005 : i32
    %30 = vector.broadcast %c2146121005_i32 : i32 to vector<16x128xi32>
    %31 = arith.muli %29, %30 : vector<16x128xi32>
    %c15_i32 = arith.constant 15 : i32
    %32 = vector.broadcast %c15_i32 : i32 to vector<16x128xi32>
    %33 = arith.shrui %31, %32 : vector<16x128xi32>
    %34 = arith.xori %31, %33 : vector<16x128xi32>
    %c1_i32 = arith.constant 1 : i32
    %35 = vector.broadcast %c1_i32 : i32 to vector<16x128xi32>
    %36 = arith.shrui %34, %35 : vector<16x128xi32>
    %c1503238553_i32 = arith.constant 1503238553 : i32
    %37 = vector.broadcast %c1503238553_i32 : i32 to vector<16x128xi32>
    %38 = arith.cmpi slt, %36, %37 : vector<16x128xi32>
    %cst_10 = arith.constant 1.42857146 : f32
    %39 = vector.broadcast %cst_10 : f32 to vector<16x128xf32>
    %40 = arith.mulf %13, %39 : vector<16x128xf32>
    %cst_11 = arith.constant 0.000000e+00 : f32
    %41 = vector.broadcast %cst_11 : f32 to vector<16x128xf32>
    %42 = arith.select %38, %40, %41 : vector<16x128xi1>, vector<16x128xf32>
    %43 = arith.truncf %42 : vector<16x128xf32> to vector<16x128xbf16>
    %c0_12 = arith.constant 0 : index
    %c0_13 = arith.constant 0 : index
    %44 = vector.load %arg5[%c0_12, %c0_13] : memref<128x64xbf16, #tpu.memory_space<vmem>>, vector<128x64xbf16>
    %cst_14 = arith.constant dense<0.000000e+00> : vector<16x64xf32>
    %45 = tpu.matmul %43, %44, %cst_14 {dimension_numbers = #tpu.dot_dimension_numbers<[1], [0], [0], [1], [0, 0, 1, 1], [], []>} : vector<16x128xbf16>, vector<128x64xbf16>, vector<16x64xf32> -> vector<16x64xf32>
    %c0_15 = arith.constant 0 : index
    %c0_16 = arith.constant 0 : index
    %46 = vector.load %arg6[%c0_15, %c0_16] : memref<1x64xf32, #tpu.memory_space<vmem>>, vector<1x64xf32>
    %47 = vector.broadcast %46 : vector<1x64xf32> to vector<16x64xf32>
    %48 = arith.addf %45, %47 : vector<16x64xf32>
    %cst_17 = arith.constant 0.000000e+00 : f32
    %49 = vector.broadcast %cst_17 : f32 to vector<16x64xf32>
    %50 = arith.cmpf oge, %48, %49 : vector<16x64xf32>
    %cst_18 = arith.constant 2.000000e-01 : f32
    %51 = vector.broadcast %cst_18 : f32 to vector<16x64xf32>
    %52 = arith.mulf %51, %48 : vector<16x64xf32>
    %53 = arith.select %50, %48, %52 : vector<16x64xi1>, vector<16x64xf32>
    %54 = tpu.iota {dimensions = array<i32: 0>} : vector<16x64xi32>
    %55 = tpu.iota {dimensions = array<i32: 1>} : vector<16x64xi32>
    %c-1640531535_i32_19 = arith.constant -1640531535 : i32
    %56 = arith.muli %1, %c-1640531535_i32_19 : i32
    %c-1028477379_i32_20 = arith.constant -1028477379 : i32
    %57 = arith.muli %0, %c-1028477379_i32_20 : i32
    %58 = arith.addi %56, %57 : i32
    %c34_i32 = arith.constant 34 : i32
    %59 = arith.addi %58, %c34_i32 : i32
    %c-1640531535_i32_21 = arith.constant -1640531535 : i32
    %60 = vector.broadcast %c-1640531535_i32_21 : i32 to vector<16x64xi32>
    %61 = arith.muli %54, %60 : vector<16x64xi32>
    %c-2048144777_i32_22 = arith.constant -2048144777 : i32
    %62 = vector.broadcast %c-2048144777_i32_22 : i32 to vector<16x64xi32>
    %63 = arith.muli %55, %62 : vector<16x64xi32>
    %64 = arith.addi %61, %63 : vector<16x64xi32>
    %65 = vector.broadcast %59 : i32 to vector<16x64xi32>
    %66 = arith.addi %64, %65 : vector<16x64xi32>
    %c16_i32_23 = arith.constant 16 : i32
    %67 = vector.broadcast %c16_i32_23 : i32 to vector<16x64xi32>
    %68 = arith.shrui %66, %67 : vector<16x64xi32>
    %69 = arith.xori %66, %68 : vector<16x64xi32>
    %c2146121005_i32_24 = arith.constant 2146121005 : i32
    %70 = vector.broadcast %c2146121005_i32_24 : i32 to vector<16x64xi32>
    %71 = arith.muli %69, %70 : vector<16x64xi32>
    %c15_i32_25 = arith.constant 15 : i32
    %72 = vector.broadcast %c15_i32_25 : i32 to vector<16x64xi32>
    %73 = arith.shrui %71, %72 : vector<16x64xi32>
    %74 = arith.xori %71, %73 : vector<16x64xi32>
    %c1_i32_26 = arith.constant 1 : i32
    %75 = vector.broadcast %c1_i32_26 : i32 to vector<16x64xi32>
    %76 = arith.shrui %74, %75 : vector<16x64xi32>
    %c1503238553_i32_27 = arith.constant 1503238553 : i32
    %77 = vector.broadcast %c1503238553_i32_27 : i32 to vector<16x64xi32>
    %78 = arith.cmpi slt, %76, %77 : vector<16x64xi32>
    %cst_28 = arith.constant 1.42857146 : f32
    %79 = vector.broadcast %cst_28 : f32 to vector<16x64xf32>
    %80 = arith.mulf %53, %79 : vector<16x64xf32>
    %cst_29 = arith.constant 0.000000e+00 : f32
    %81 = vector.broadcast %cst_29 : f32 to vector<16x64xf32>
    %82 = arith.select %78, %80, %81 : vector<16x64xi1>, vector<16x64xf32>
    %83 = arith.truncf %82 : vector<16x64xf32> to vector<16x64xbf16>
    %c0_30 = arith.constant 0 : index
    %c0_31 = arith.constant 0 : index
    %84 = vector.load %arg7[%c0_30, %c0_31] : memref<64x32xbf16, #tpu.memory_space<vmem>>, vector<64x32xbf16>
    %cst_32 = arith.constant dense<0.000000e+00> : vector<16x32xf32>
    %85 = tpu.matmul %83, %84, %cst_32 {dimension_numbers = #tpu.dot_dimension_numbers<[1], [0], [0], [1], [0, 0, 1, 1], [], []>} : vector<16x64xbf16>, vector<64x32xbf16>, vector<16x32xf32> -> vector<16x32xf32>
    %c0_33 = arith.constant 0 : index
    %c0_34 = arith.constant 0 : index
    %86 = vector.load %arg8[%c0_33, %c0_34] : memref<1x32xf32, #tpu.memory_space<vmem>>, vector<1x32xf32>
    %87 = vector.broadcast %86 : vector<1x32xf32> to vector<16x32xf32>
    %88 = arith.addf %85, %87 : vector<16x32xf32>
    %cst_35 = arith.constant 0.000000e+00 : f32
    %89 = vector.broadcast %cst_35 : f32 to vector<16x32xf32>
    %90 = arith.cmpf oge, %88, %89 : vector<16x32xf32>
    %cst_36 = arith.constant 2.000000e-01 : f32
    %91 = vector.broadcast %cst_36 : f32 to vector<16x32xf32>
    %92 = arith.mulf %91, %88 : vector<16x32xf32>
    %93 = arith.select %90, %88, %92 : vector<16x32xi1>, vector<16x32xf32>
    %94 = tpu.iota {dimensions = array<i32: 0>} : vector<16x32xi32>
    %95 = tpu.iota {dimensions = array<i32: 1>} : vector<16x32xi32>
    %c-1640531535_i32_37 = arith.constant -1640531535 : i32
    %96 = arith.muli %1, %c-1640531535_i32_37 : i32
    %c-1028477379_i32_38 = arith.constant -1028477379 : i32
    %97 = arith.muli %0, %c-1028477379_i32_38 : i32
    %98 = arith.addi %96, %97 : i32
    %c51_i32 = arith.constant 51 : i32
    %99 = arith.addi %98, %c51_i32 : i32
    %c-1640531535_i32_39 = arith.constant -1640531535 : i32
    %100 = vector.broadcast %c-1640531535_i32_39 : i32 to vector<16x32xi32>
    %101 = arith.muli %94, %100 : vector<16x32xi32>
    %c-2048144777_i32_40 = arith.constant -2048144777 : i32
    %102 = vector.broadcast %c-2048144777_i32_40 : i32 to vector<16x32xi32>
    %103 = arith.muli %95, %102 : vector<16x32xi32>
    %104 = arith.addi %101, %103 : vector<16x32xi32>
    %105 = vector.broadcast %99 : i32 to vector<16x32xi32>
    %106 = arith.addi %104, %105 : vector<16x32xi32>
    %c16_i32_41 = arith.constant 16 : i32
    %107 = vector.broadcast %c16_i32_41 : i32 to vector<16x32xi32>
    %108 = arith.shrui %106, %107 : vector<16x32xi32>
    %109 = arith.xori %106, %108 : vector<16x32xi32>
    %c2146121005_i32_42 = arith.constant 2146121005 : i32
    %110 = vector.broadcast %c2146121005_i32_42 : i32 to vector<16x32xi32>
    %111 = arith.muli %109, %110 : vector<16x32xi32>
    %c15_i32_43 = arith.constant 15 : i32
    %112 = vector.broadcast %c15_i32_43 : i32 to vector<16x32xi32>
    %113 = arith.shrui %111, %112 : vector<16x32xi32>
    %114 = arith.xori %111, %113 : vector<16x32xi32>
    %c1_i32_44 = arith.constant 1 : i32
    %115 = vector.broadcast %c1_i32_44 : i32 to vector<16x32xi32>
    %116 = arith.shrui %114, %115 : vector<16x32xi32>
    %c1503238553_i32_45 = arith.constant 1503238553 : i32
    %117 = vector.broadcast %c1503238553_i32_45 : i32 to vector<16x32xi32>
    %118 = arith.cmpi slt, %116, %117 : vector<16x32xi32>
    %cst_46 = arith.constant 1.42857146 : f32
    %119 = vector.broadcast %cst_46 : f32 to vector<16x32xf32>
    %120 = arith.mulf %93, %119 : vector<16x32xf32>
    %cst_47 = arith.constant 0.000000e+00 : f32
    %121 = vector.broadcast %cst_47 : f32 to vector<16x32xf32>
    %122 = arith.select %118, %120, %121 : vector<16x32xi1>, vector<16x32xf32>
    %c0_48 = arith.constant 0 : index
    %c0_49 = arith.constant 0 : index
    %123 = vector.load %arg9[%c0_48, %c0_49] : memref<1x32xf32, #tpu.memory_space<vmem>>, vector<1x32xf32>
    %124 = vector.broadcast %123 : vector<1x32xf32> to vector<16x32xf32>
    %125 = arith.mulf %122, %124 : vector<16x32xf32>
    %126 = tpu.transpose %125, [1, 0] : vector<16x32xf32> -> vector<32x16xf32>
    %cst_50 = arith.constant dense<0.000000e+00> : vector<16xf32>
    %127 = vector.multi_reduction <add>, %126, %cst_50 [0] : vector<32x16xf32> to vector<16xf32>
    %128 = vector.shape_cast %127 : vector<16xf32> to vector<1x16xf32>
    %c0_51 = arith.constant 0 : index
    %c0_52 = arith.constant 0 : index
    %129 = vector.load %arg10[%c0_51, %c0_52] : memref<1x1xf32, #tpu.memory_space<vmem>>, vector<1x1xf32>
    %130 = vector.broadcast %129 : vector<1x1xf32> to vector<1x16xf32>
    %131 = arith.addf %128, %130 : vector<1x16xf32>
    %132 = arith.negf %131 : vector<1x16xf32>
    %133 = math.exp %132 : vector<1x16xf32>
    %cst_53 = arith.constant 1.000000e+00 : f32
    %134 = vector.broadcast %cst_53 : f32 to vector<1x16xf32>
    %135 = arith.addf %134, %133 : vector<1x16xf32>
    %136 = arith.divf %134, %135 : vector<1x16xf32>
    %137 = vector.shape_cast %136 : vector<1x16xf32> to vector<1x1x16xf32>
    %c0_54 = arith.constant 0 : index
    %c0_55 = arith.constant 0 : index
    %c0_56 = arith.constant 0 : index
    %138 = vector.load %arg11[%c0_54, %c0_55, %c0_56] : memref<1x1x16xf32, #tpu.memory_space<vmem>>, vector<1x1x16xf32>
    tpu.vector_store %arg11[%c0_54, %c0_55, %c0_56], %137 {strides = array<i32>} : memref<1x1x16xf32, #tpu.memory_space<vmem>>, vector<1x1x16xf32>,
    return
  }
  func.func @transform_0(%arg0: i32, %arg1: memref<1xi32, #tpu.memory_space<smem>>) -> (i32, i32) {
    %c0_i32 = arith.constant 0 : i32
    %c0_i32_0 = arith.constant 0 : i32
    return %arg0, %c0_i32 : i32, i32
  }
  func.func @transform_1(%arg0: i32, %arg1: memref<1xi32, #tpu.memory_space<smem>>) -> (i32, i32) {
    %c0_i32 = arith.constant 0 : i32
    %c0_i32_0 = arith.constant 0 : i32
    %c0_i32_1 = arith.constant 0 : i32
    return %c0_i32, %c0_i32_0 : i32, i32
  }
  func.func @transform_2(%arg0: i32, %arg1: memref<1xi32, #tpu.memory_space<smem>>) -> (i32, i32) {
    %c0_i32 = arith.constant 0 : i32
    %c0_i32_0 = arith.constant 0 : i32
    %c0_i32_1 = arith.constant 0 : i32
    return %c0_i32, %c0_i32_0 : i32, i32
  }
  func.func @transform_3(%arg0: i32, %arg1: memref<1xi32, #tpu.memory_space<smem>>) -> (i32, i32) {
    %c0_i32 = arith.constant 0 : i32
    %c0_i32_0 = arith.constant 0 : i32
    %c0_i32_1 = arith.constant 0 : i32
    return %c0_i32, %c0_i32_0 : i32, i32
  }
  func.func @transform_4(%arg0: i32, %arg1: memref<1xi32, #tpu.memory_space<smem>>) -> (i32, i32) {
    %c0_i32 = arith.constant 0 : i32
    %c0_i32_0 = arith.constant 0 : i32
    %c0_i32_1 = arith.constant 0 : i32
    return %c0_i32, %c0_i32_0 : i32, i32
  }
  func.func @transform_5(%arg0: i32, %arg1: memref<1xi32, #tpu.memory_space<smem>>) -> (i32, i32) {
    %c0_i32 = arith.constant 0 : i32
    %c0_i32_0 = arith.constant 0 : i32
    %c0_i32_1 = arith.constant 0 : i32
    return %c0_i32, %c0_i32_0 : i32, i32
  }
  func.func @transform_6(%arg0: i32, %arg1: memref<1xi32, #tpu.memory_space<smem>>) -> (i32, i32) {
    %c0_i32 = arith.constant 0 : i32
    %c0_i32_0 = arith.constant 0 : i32
    %c0_i32_1 = arith.constant 0 : i32
    return %c0_i32, %c0_i32_0 : i32, i32
  }
  func.func @transform_7(%arg0: i32, %arg1: memref<1xi32, #tpu.memory_space<smem>>) -> (i32, i32) {
    %c0_i32 = arith.constant 0 : i32
    %c0_i32_0 = arith.constant 0 : i32
    %c0_i32_1 = arith.constant 0 : i32
    return %c0_i32, %c0_i32_0 : i32, i32
  }
  func.func @transform_8(%arg0: i32, %arg1: memref<1xi32, #tpu.memory_space<smem>>) -> (i32, i32) {
    %c0_i32 = arith.constant 0 : i32
    %c0_i32_0 = arith.constant 0 : i32
    %c0_i32_1 = arith.constant 0 : i32
    return %c0_i32, %c0_i32_0 : i32, i32
  }
  func.func @transform_9(%arg0: i32, %arg1: memref<1xi32, #tpu.memory_space<smem>>) -> (i32, i32, i32) {
    %c0_i32 = arith.constant 0 : i32
    %c0_i32_0 = arith.constant 0 : i32
    %c0_i32_1 = arith.constant 0 : i32
    return %arg0, %c0_i32, %c0_i32_0 : i32, i32, i32
  }
}

</mosaic_0001>

<bundles_post_ra>
// kernel: discriminator_forward.1
= control target key start
LH: loop header
LB: loop body
LE: loop exit
PB: predicated region body
PF: predicated region fallthrough
CT: control target
= control target key end

     0   :  { %vm1422_vm0 = vmmov 0   ;;  %vm967_vm10 = vcmask 523264   ;;  %vm1081_vm15 = vcmask 130048   ;;  %s1810_s2 = inlined_call_operand.vmem [shape: bf16[1024,128], index: 2, kind: input, shape index: {}]   ;;  %s1811_s1 = inlined_call_operand.vmem [shape: f32[16,1024], index: 1, kind: input, shape index: {}]   ;;  %s1812_s4 = inlined_call_operand.vmem [shape: bf16[128,64], index: 4, kind: input, shape index: {}]   ;;  %s1813_s0 = inlined_call_operand.<no memory space> [shape: s32[1], index: 0, kind: input, shape index: {}]   ;;  %s1814_s3 = inlined_call_operand.vmem [shape: f32[1,128], index: 3, kind: input, shape index: {}]   ;;  %s1815_s6 = inlined_call_operand.vmem [shape: bf16[64,32], index: 6, kind: input, shape index: {}]   ;;  %s1816_s9 = inlined_call_operand.<no memory space> [shape: f32[1,1], index: 9, kind: input, shape index: {}]   ;;  %s1817_s5 = inlined_call_operand.vmem [shape: f32[1,64], index: 5, kind: input, shape index: {}]   ;;  %s1818_s7 = inlined_call_operand.vmem [shape: f32[1,32], index: 7, kind: input, shape index: {}]   ;;  %s1819_s8 = inlined_call_operand.vmem [shape: f32[1,32], index: 8, kind: input, shape index: {}]   ;;  %s1820_s10 = inlined_call_operand.vmem [shape: f32[1,1,16], index: 10, kind: output, shape index: {}]  }
   0x1   :  { %v1341_v0 = vld [vmem:[%s1810_s2 + $0x78] sm:$0xff]   ;;  %v1345_v4 = vld [vmem:[%s1810_s2 + $0x70] sm:$0xff]   ;;  %v1349_v8 = vld [vmem:[%s1810_s2 + $0x68] sm:$0xff]   ;;  %s1760_s28 = smul.u32 3266489917, %s1813_s0 }
   0x2   :  { %v1342_v1 = vld [vmem:[%s1810_s2 + $0xf8] sm:$0xff]   ;;  %1203 = vmatprep.subr.bf16.mxu0 %v1341_v0  ;;  %v1346_v5 = vld [vmem:[%s1810_s2 + $0xf0] sm:$0xff]   ;;  %v1350_v9 = vld [vmem:[%s1810_s2 + $0xe8] sm:$0xff]  }
   0x3   :  { %v1343_v2 = vld [vmem:[%s1810_s2 + $0x38] sm:$0xff]   ;;  %1225 = vmatprep.subr.bf16.mxu1 %v1342_v1  ;;  %v1347_v6 = vld [vmem:[%s1810_s2 + $0x30] sm:$0xff]   ;;  %v1351_v10 = vld [vmem:[%s1810_s2 + $0x28] sm:$0xff]   ;;  %s905_s18 = sadd.s32 34, %s1760_s28 }
   0x4   :  { %v1344_v3 = vld [vmem:[%s1810_s2 + $0xb8] sm:$0xff]   ;;  %1204 = vmatpush3.bf16.msra.mxu0 %v1343_v2  ;;  %v1348_v7 = vld [vmem:[%s1810_s2 + $0xb0] sm:$0xff]   ;;  %v1352_v11 = vld [vmem:[%s1810_s2 + $0xa8] sm:$0xff]  }
   0x5   :  { %1226 = vmatpush3.bf16.msra.mxu1 %v1344_v3  ;;  %1205 = vmatprep.subr.bf16.mxu0 %v1345_v4  ;;  %v1353_v12 = vld [vmem:[%s1810_s2 + $0x60] sm:$0xff]   ;;  %v1357_v16 = vld [vmem:[%s1810_s2 + $0x58] sm:$0xff]   ;;  %v1361_v20 = vld [vmem:[%s1810_s2 + $0x50] sm:$0xff]  }
   0x6   :  { %1227 = vmatprep.subr.bf16.mxu1 %v1346_v5  ;;  %v1354_v13 = vld [vmem:[%s1810_s2 + $0xe0] sm:$0xff]   ;;  %v1358_v17 = vld [vmem:[%s1810_s2 + $0xd8] sm:$0xff]   ;;  %v1362_v21 = vld [vmem:[%s1810_s2 + $0xd0] sm:$0xff]  }
   0x7   :  { %v1355_v14 = vld [vmem:[%s1810_s2 + $0x20] sm:$0xff]   ;;  %v1359_v18 = vld [vmem:[%s1810_s2 + $0x18] sm:$0xff]   ;;  %v1363_v22 = vld [vmem:[%s1810_s2 + $0x10] sm:$0xff]  }
   0x8   :  { %1206 = vmatpush3.bf16.msra.mxu0 %v1347_v6  ;;  %v1356_v15 = vld [vmem:[%s1810_s2 + $0xa0] sm:$0xff]   ;;  %v1360_v19 = vld [vmem:[%s1810_s2 + $0x98] sm:$0xff]   ;;  %v1364_v23 = vld [vmem:[%s1810_s2 + $0x90] sm:$0xff]  }
   0x9   :  { %1228 = vmatpush3.bf16.msra.mxu1 %v1348_v7  ;;  %1207 = vmatprep.subr.bf16.mxu0 %v1349_v8  ;;  %v1365_v24 = vld [vmem:[%s1810_s2 + $0x48] sm:$0xff]   ;;  %v1369_v28 = vld [vmem:[%s1810_s2 + $0x40] sm:$0xff]   ;;  %v41_v34 = vld [vmem:[%s1811_s1 + $0x18] sm:$0xff] }
   0xa   :  { %1229 = vmatprep.subr.bf16.mxu1 %v1350_v9  ;;  %v1366_v25 = vld [vmem:[%s1810_s2 + $0xc8] sm:$0xff]   ;;  %v1370_v29 = vld [vmem:[%s1810_s2 + $0xc0] sm:$0xff]   ;;  %v49_v36 = vld [vmem:[%s1811_s1 + $0x58] sm:$0xff] }
   0xb   :  { %v1367_v26 = vld [vmem:[%s1810_s2 + $0x8] sm:$0xff]   ;;  %v1371_v30 = vld [vmem:[%s1810_s2] sm:$0xff]   ;;  %v57_v39 = vpack.c.bf16 %v49_v36, %v41_v34  ;;  %v40_v41 = vld [vmem:[%s1811_s1 + $0x10] sm:$0xff] }
   0xc   :  { %1208 = vmatpush3.bf16.msra.mxu0 %v1351_v10  ;;  %v1368_v27 = vld [vmem:[%s1810_s2 + $0x88] sm:$0xff]   ;;  %v1372_v31 = vld [vmem:[%s1810_s2 + $0x80] sm:$0xff]   ;;  %v48_v42 = vld [vmem:[%s1811_s1 + $0x50] sm:$0xff] }
   0xd   :  { %1230 = vmatpush3.bf16.msra.mxu1 %v1352_v11  ;;  %1209 = vmatprep.subr.bf16.mxu0 %v1353_v12  ;;  %v39_v32 = vld [vmem:[%s1811_s1 + $0x8] sm:$0xff]  ;;  %v38_v37 = vld [vmem:[%s1811_s1] sm:$0xff]  ;;  %v56_v43 = vpack.c.bf16 %v48_v42, %v40_v41  ;;  %v1373_v44 = vld [vmem:[%s1810_s2 + $0x178] sm:$0xff]  }
   0xe   :  { %1231 = vmatprep.subr.bf16.mxu1 %v1354_v13  ;;  %v47_v33 = vld [vmem:[%s1811_s1 + $0x48] sm:$0xff]  ;;  %v46_v38 = vld [vmem:[%s1811_s1 + $0x40] sm:$0xff]  ;;  %654 = vmatprep.mubr.bf16.mxu1 %v57_v39  ;;  %v1374_v45 = vld [vmem:[%s1810_s2 + $0x1f8] sm:$0xff]  }
   0xf   :  { %v55_v35 = vpack.c.bf16 %v47_v33, %v39_v32  ;;  %v54_v40 = vpack.c.bf16 %v46_v38, %v38_v37  ;;  %v1375_v46 = vld [vmem:[%s1810_s2 + $0x138] sm:$0xff]   ;;  %v1377_v48 = vld [vmem:[%s1810_s2 + $0x170] sm:$0xff]   ;;  %v1381_v52 = vld [vmem:[%s1810_s2 + $0x168] sm:$0xff]   ;;  %v751_v33 = vlaneseq }
  0x10   :  { %1210 = vmatpush3.bf16.msra.mxu0 %v1355_v14  ;;  %v1376_v47 = vld [vmem:[%s1810_s2 + $0x1b8] sm:$0xff]   ;;  %v1378_v49 = vld [vmem:[%s1810_s2 + $0x1f0] sm:$0xff]   ;;  %v1382_v53 = vld [vmem:[%s1810_s2 + $0x1e8] sm:$0xff]  }
  0x11   :  { %1232 = vmatpush3.bf16.msra.mxu1 %v1356_v15  ;;  %1211 = vmatprep.subr.bf16.mxu0 %v1357_v16  ;;  %v1379_v50 = vld [vmem:[%s1810_s2 + $0x130] sm:$0xff]   ;;  %v1383_v54 = vld [vmem:[%s1810_s2 + $0x128] sm:$0xff]   ;;  %v1385_v56 = vld [vmem:[%s1810_s2 + $0x160] sm:$0xff]   ;;  %v1754_v34 = vshrl.u32 %v751_v33, 7  ;;  %v755_v36 = vand.u32 127, %v751_v33 }
  0x12   :  { %1233 = vmatprep.subr.bf16.mxu1 %v1358_v17  ;;  %613 = vmatprep.mubr.bf16.mxu0 %v55_v35  ;;  %v1380_v51 = vld [vmem:[%s1810_s2 + $0x1b0] sm:$0xff]   ;;  %v1384_v55 = vld [vmem:[%s1810_s2 + $0x1a8] sm:$0xff]   ;;  %v1386_v57 = vld [vmem:[%s1810_s2 + $0x1e0] sm:$0xff]  }
  0x13   :  { %v1387_v58 = vld [vmem:[%s1810_s2 + $0x120] sm:$0xff]   ;;  %v1389_v60 = vld [vmem:[%s1810_s2 + $0x158] sm:$0xff]   ;;  %v1393_v0 = vld [vmem:[%s1810_s2 + $0x150] sm:$0xff]   ;;  %v753_v35 = vadd.s32 8, %v1754_v34  ;;  %v760_v37 = vmul.u32 2654435761, %v1754_v34 }
  0x14   :  { %1212 = vmatpush3.bf16.msra.mxu0 %v1359_v18  ;;  %v1388_v59 = vld [vmem:[%s1810_s2 + $0x1a0] sm:$0xff]   ;;  %v1390_v61 = vld [vmem:[%s1810_s2 + $0x1d8] sm:$0xff]   ;;  %v1394_v1 = vld [vmem:[%s1810_s2 + $0x1d0] sm:$0xff]   ;;  %v762_v39 = vmul.u32 2246822519, %v755_v36 }
  0x15   :  { %1234 = vmatpush3.bf16.msra.mxu1 %v1360_v19  ;;  %1213 = vmatprep.subr.bf16.mxu0 %v1361_v20  ;;  %v1391_v62 = vld [vmem:[%s1810_s2 + $0x118] sm:$0xff]   ;;  %v1395_v2 = vld [vmem:[%s1810_s2 + $0x110] sm:$0xff]   ;;  %v1397_v4 = vld [vmem:[%s1810_s2 + $0x148] sm:$0xff]   ;;  %v761_v38 = vmul.u32 2654435761, %v753_v35 }
  0x16   :  { %1235 = vmatprep.subr.bf16.mxu1 %v1362_v21  ;;  %v1392_v63 = vld [vmem:[%s1810_s2 + $0x198] sm:$0xff]   ;;  %v1396_v3 = vld [vmem:[%s1810_s2 + $0x190] sm:$0xff]   ;;  %v1398_v5 = vld [vmem:[%s1810_s2 + $0x1c8] sm:$0xff]  }
  0x17   :  { %v1399_v6 = vld [vmem:[%s1810_s2 + $0x108] sm:$0xff]   ;;  %v1401_v8 = vld [vmem:[%s1810_s2 + $0x140] sm:$0xff]   ;;  %v45_v14 = vld [vmem:[%s1811_s1 + $0x38] sm:$0xff]  ;;  %v1766_v41 = vadd.s32 %v762_v39, %v761_v38 }
  0x18   :  { %1214 = vmatpush3.bf16.msra.mxu0 %v1363_v22  ;;  %v1400_v7 = vld [vmem:[%s1810_s2 + $0x188] sm:$0xff]   ;;  %v1402_v9 = vld [vmem:[%s1810_s2 + $0x1c0] sm:$0xff]   ;;  %v53_v15 = vld [vmem:[%s1811_s1 + $0x78] sm:$0xff] }
  0x19   :  { %1236 = vmatpush3.bf16.msra.mxu1 %v1364_v23  ;;  %1215 = vmatprep.subr.bf16.mxu0 %v1365_v24  ;;  %v1403_v10 = vld [vmem:[%s1810_s2 + $0x100] sm:$0xff]   ;;  %v43_v12 = vld [vmem:[%s1811_s1 + $0x28] sm:$0xff]  ;;  %v61_v17 = vpack.c.bf16 %v53_v15, %v45_v14  ;;  %v44_v20 = vld [vmem:[%s1811_s1 + $0x30] sm:$0xff]  ;;  %v1421_v24 = vmov 0.0  }
  0x1a   :  { %1237 = vmatprep.subr.bf16.mxu1 %v1366_v25  ;;  %v1404_v11 = vld [vmem:[%s1810_s2 + $0x180] sm:$0xff]   ;;  %v51_v13 = vld [vmem:[%s1811_s1 + $0x68] sm:$0xff]  ;;  %v52_v22 = vld [vmem:[%s1811_s1 + $0x70] sm:$0xff] }
  0x1b   :  { %v59_v16 = vpack.c.bf16 %v51_v13, %v43_v12  ;;  %v42_v18 = vld [vmem:[%s1811_s1 + $0x20] sm:$0xff]  ;;  %v60_v23 = vpack.c.bf16 %v52_v22, %v44_v20  ;;  %v1405_v25 = vld [vmem:[%s1812_s4 + $0x38] sm:$0xff]   ;;  %v1414_v36 = vld [vmem:[%s1815_s6 + $0x10] sm:$0xff]  }
  0x1c   :  { %1216 = vmatpush3.bf16.msra.mxu0 %v1367_v26  ;;  %v50_v19 = vld [vmem:[%s1811_s1 + $0x60] sm:$0xff]  ;;  %v1406_v26 = vld [vmem:[%s1812_s4 + $0x30] sm:$0xff]   ;;  %v1413_v35 = vld [vmem:[%s1815_s6 + $0x18] sm:$0xff]  }
  0x1d   :  { %1238 = vmatpush3.bf16.msra.mxu1 %v1368_v27  ;;  %1217 = vmatprep.subr.bf16.mxu0 %v1369_v28  ;;  %v58_v21 = vpack.c.bf16 %v50_v19, %v42_v18  ;;  %v1407_v27 = vld [vmem:[%s1812_s4 + $0x28] sm:$0xff]   ;;  %v1408_v28 = vld [vmem:[%s1812_s4 + $0x20] sm:$0xff]  }
  0x1e   :  { %1239 = vmatprep.subr.bf16.mxu1 %v1370_v29  ;;  %v1409_v29 = vld [vmem:[%s1812_s4 + $0x18] sm:$0xff]   ;;  %v1412_v32 = vld [vmem:[%s1812_s4] sm:$0xff]  }
  0x1f   :  { %v1416_v38 = vld [vmem:[%s1815_s6] sm:$0xff]  }
  0x20   :  { %1218 = vmatpush3.bf16.msra.mxu0 %v1371_v30  ;;  %v1410_v30 = vld [vmem:[%s1812_s4 + $0x10] sm:$0xff]  }
  0x21   :  { %1240 = vmatpush3.bf16.msra.mxu1 %v1372_v31  ;;  %1247 = vmatprep.subr.bf16.mxu0 %v1373_v44  ;;  %v1411_v31 = vld [vmem:[%s1812_s4 + $0x8] sm:$0xff]   ;;  %s759_s4 = sadd.s32 17, %s1760_s28 }
  0x22   :  { %1269 = vmatprep.subr.bf16.mxu1 %v1374_v45  ;;  %v765_v42 = vstv %s759_s4 }
  0x23   :  { %614 = vmatmul.mubr.bf16.vlgmr.msra.gmra.mxu0 %v54_v40  ;;  %v1764_v40 = vadd.s32 %v762_v39, %v760_v37  ;;  %v767_v45 = vadd.s32 %v765_v42, %v1766_v41  ;;  %v1415_v37 = vld [vmem:[%s1815_s6 + $0x8] sm:$0xff]   ;;  %v1423_v39 = vmov 0  }
  0x24   :  { %655 = vmatmul.mubr.bf16.vlgmr.msra.gmra.mxu1 %v56_v43  ;;  %1248 = vmatpush3.bf16.msra.mxu0 %v1375_v46 }
  0x25   :  { %1270 = vmatpush3.bf16.msra.mxu1 %v1376_v47  ;;  %1249 = vmatprep.subr.bf16.mxu0 %v1377_v48  ;;  %v766_v44 = vadd.s32 %v765_v42, %v1764_v40  ;;  %v16_v42 = vstv %s1816_s9 }
  0x26   :  { %1271 = vmatprep.subr.bf16.mxu1 %v1378_v49  ;;  %695 = vmatprep.mubr.bf16.mxu0 %v59_v16  ;;  %v769_v49 = vshrl.u32 %v767_v45, 16  ;;  %17 = vst [vmem:[#allocation4] sm:$0x1] %v16_v42 }
  0x27   :  { %736 = vmatprep.mubr.bf16.mxu1 %v61_v17  ;;  %v768_v48 = vshrl.u32 %v766_v44, 16  ;;  %1340 = vset.pattern.permute.xlu0 %v1423_v39 }
  0x28   :  { %1250 = vmatpush3.bf16.msra.mxu0 %v1379_v50 }
  0x29   :  { %1272 = vmatpush3.bf16.msra.mxu1 %v1380_v51  ;;  %1251 = vmatprep.subr.bf16.mxu0 %v1381_v52  ;;  %v770_v52 = vxor.u32 %v768_v48, %v766_v44  ;;  %v906_v44 = vstv %s905_s18 }
  0x2a   :  { %1273 = vmatprep.subr.bf16.mxu1 %v1382_v53  ;;  %v771_v53 = vxor.u32 %v769_v49, %v767_v45  ;;  %v907_v45 = vadd.s32 %v906_v44, %v1764_v40 }
  0x2c   :  { %1252 = vmatpush3.bf16.msra.mxu0 %v1383_v54 }
  0x2d   :  { %1274 = vmatpush3.bf16.msra.mxu1 %v1384_v55  ;;  %1253 = vmatprep.subr.bf16.mxu0 %v1385_v56  ;;  %v1118_v56 = vld [vmem:[%s1814_s3] ss:$0 sm:$0xff] }
  0x2e   :  { %1275 = vmatprep.subr.bf16.mxu1 %v1386_v57 }
  0x30   :  { %1254 = vmatpush3.bf16.msra.mxu0 %v1387_v58  ;;  %v772_v58 = vmul.u32 2146121005, %v770_v52 }
  0x31   :  { %1276 = vmatpush3.bf16.msra.mxu1 %v1388_v59  ;;  %1255 = vmatprep.subr.bf16.mxu0 %v1389_v60  ;;  %v773_v59 = vmul.u32 2146121005, %v771_v53 }
  0x32   :  { %1277 = vmatprep.subr.bf16.mxu1 %v1390_v61 }
  0x34   :  { %1256 = vmatpush3.bf16.msra.mxu0 %v1391_v62 }
  0x35   :  { %1278 = vmatpush3.bf16.msra.mxu1 %v1392_v63  ;;  %1257 = vmatprep.subr.bf16.mxu0 %v1393_v0 }
  0x36   :  { %1279 = vmatprep.subr.bf16.mxu1 %v1394_v1 }
  0x38   :  { %1258 = vmatpush3.bf16.msra.mxu0 %v1395_v2 }
  0x39   :  { %1280 = vmatpush3.bf16.msra.mxu1 %v1396_v3  ;;  %1259 = vmatprep.subr.bf16.mxu0 %v1397_v4  ;;  %v774_v3 = vshrl.u32 %v772_v58, 15  ;;  %v775_v4 = vshrl.u32 %v773_v59, 15 }
  0x3a   :  { %1281 = vmatprep.subr.bf16.mxu1 %v1398_v5 }
  0x3b   :  { %v776_v15 = vxor.u32 %v774_v3, %v772_v58  ;;  %v777_v16 = vxor.u32 %v775_v4, %v773_v59 }
  0x3c   :  { %1260 = vmatpush3.bf16.msra.mxu0 %v1399_v6 }
  0x3d   :  { %1282 = vmatpush3.bf16.msra.mxu1 %v1400_v7  ;;  %1261 = vmatprep.subr.bf16.mxu0 %v1401_v8 }
  0x3e   :  { %1283 = vmatprep.subr.bf16.mxu1 %v1402_v9 }
  0x40   :  { %1262 = vmatpush3.bf16.msra.mxu0 %v1403_v10 }
  0x41   :  { %1284 = vmatpush3.bf16.msra.mxu1 %v1404_v11  ;;  %1305 = vmatprep.subr.bf16.mxu0 %v1421_v24 }
  0x42   :  { %1325 = vmatprep.subr.bf16.mxu1 %v1421_v24 }
  0x43   :  { %696 = vmatmul.mubr.bf16.vlgmr.msra.gmra.mxu0 %v58_v21 }
  0x44   :  { %737 = vmatmul.mubr.bf16.vlgmr.msra.gmra.mxu1 %v60_v23  ;;  %1306 = vmatpush3.bf16.msra.mxu0 %v1405_v25  ;;  %v778_v25 = vshrl.u32 %v776_v15, 1 }
  0x45   :  { %1307 = vmatprep.subr.bf16.mxu0 %v1421_v24  ;;  %1321 = vmatprep.mubr.msk.bf16.mxu0 %vm1422_vm0, %v1421_v24 }
  0x46   :  { %1333 = vmatprep.mubr.msk.bf16.mxu1 %vm1422_vm0, %v1421_v24  ;;  %vm780_vm3 = vcmp.lt.s32.totalorder %v778_v25, 1503238553  ;;  %1326 = vmatpush3.bf16.msra.mxu1 %v1413_v35  ;;  %v1201_v35 = vld [vmem:[%s1819_s8] ss:$0 sm:$0xff]  ;;  %vm1112_vm0 = vcmask 122880  }
  0x47   :  { %1327 = vmatprep.subr.bf16.mxu1 %v1421_v24 }
  0x48   :  { %1308 = vmatpush3.bf16.msra.mxu0 %v1406_v26  ;;  %v779_v26 = vshrl.u32 %v777_v16, 1 }
  0x49   :  { %1309 = vmatprep.subr.bf16.mxu0 %v1421_v24 }
  0x4a   :  { %vm781_vm4 = vcmp.lt.s32.totalorder %v779_v26, 1503238553  ;;  %1328 = vmatpush3.bf16.msra.mxu1 %v1414_v36 }
  0x4b   :  { %vm1192_vm5 = vmpackc.low %vm781_vm4, %vm780_vm3  ;;  %1329 = vmatprep.subr.bf16.mxu1 %v1421_v24 }
  0x4c   :  { %1310 = vmatpush3.bf16.msra.mxu0 %v1407_v27 }
  0x4d   :  { %1311 = vmatprep.subr.bf16.mxu0 %v1421_v24 }
  0x4e   :  { %1330 = vmatpush3.bf16.msra.mxu1 %v1415_v37 }
  0x4f   :  { %1331 = vmatprep.subr.bf16.mxu1 %v1421_v24 }
  0x50   :  { %1312 = vmatpush3.bf16.msra.mxu0 %v1408_v28 }
  0x51   :  { %1313 = vmatprep.subr.bf16.mxu0 %v1421_v24 }
  0x52   :  { %1332 = vmatpush3.bf16.msra.mxu1 %v1416_v38 }
  0x54   :  { %1314 = vmatpush3.bf16.msra.mxu0 %v1409_v29 }
  0x55   :  { %1315 = vmatprep.subr.bf16.mxu0 %v1421_v24 }
  0x58   :  { %1316 = vmatpush3.bf16.msra.mxu0 %v1410_v30 }
  0x59   :  { %1317 = vmatprep.subr.bf16.mxu0 %v1421_v24 }
  0x5c   :  { %1318 = vmatpush3.bf16.msra.mxu0 %v1411_v31 }
  0x5d   :  { %1319 = vmatprep.subr.bf16.mxu0 %v1421_v24  ;;  %v908_v24 = vadd.s32 %v906_v44, %v1766_v41 }
  0x60   :  { %1320 = vmatpush3.bf16.msra.mxu0 %v1412_v32 }
  0xe3   :  { %v1219_v43 = vpop.f32.mrf.mxu0 }
  0xe4   :  { %v1241_v46 = vpop.f32.mrf.mxu1 }
  0xe5   :  { %v1220_v47 = vpop.f32.mrf.mxu0 }
  0xe6   :  { %v1242_v50 = vpop.f32.mrf.mxu1  ;;  %v1221_v54 = vadd.f32 %v1220_v47, %v1219_v43  ;;  %v1095_v43 = vld [vmem:[#allocation4] sm:$0x1]  ;;  %v910_v47 = vshrl.u32 %v908_v24, 16 }
  0xe7   :  { %v1222_v51 = vpop.f32.mrf.mxu0  ;;  %v1243_v61 = vadd.f32 %v1242_v50, %v1241_v46  ;;  %1098 = vperm.xlu0 %1340, %v1095_v43   ;;  %v909_v46 = vshrl.u32 %v907_v45, 16 }
  0xe8   :  { %v1244_v55 = vpop.f32.mrf.mxu1  ;;  %v616_v60 = vadd.f32 %v1221_v54, %v1118_v56  ;;  %v912_v49 = vxor.u32 %v910_v47, %v908_v24  ;;  %v1183_v54 = vld [vmem:[%s1817_s5] ss:$0 sm:$0xff]  ;;  %s1018_s5 = sadd.s32 51, %s1760_s28 }
  0xe9   :  { %v1223_v57 = vpop.f32.mrf.mxu0  ;;  %v911_v48 = vxor.u32 %v909_v46, %v907_v45 }
  0xea   :  { %v1224_v62 = vadd.f32 %v1223_v57, %v1222_v51  ;;  %v1245_v63 = vpop.f32.mrf.mxu1  ;;  %v657_v5 = vadd.f32 %v1243_v61, %v616_v60  ;;  %v914_v51 = vmul.u32 2146121005, %v912_v49 }
  0xeb   :  { %v1246_v10 = vadd.f32 %v1245_v63, %v1244_v55  ;;  %v913_v50 = vmul.u32 2146121005, %v911_v48 }
  0xec   :  { %v619_v6 = vadd.f32 %v1224_v62, %v1118_v56  ;;  %v916_v53 = vshrl.u32 %v914_v51, 15 }
  0xed   :  { %v915_v52 = vshrl.u32 %v913_v50, 15 }
  0xee   :  { %v660_v17 = vadd.f32 %v1246_v10, %v619_v6  ;;  %v918_v58 = vxor.u32 %v916_v53, %v914_v51  ;;  %v1019_v10 = vstv %s1018_s5 }
  0xef   :  { %v917_v57 = vxor.u32 %v915_v52, %v913_v50 }
  0xf1   :  { %v919_v63 = vshrl.u32 %v917_v57, 1 }
  0xf3   :  { %vm921_vm8 = vcmp.lt.s32.totalorder %v919_v63, 1503238553 }
 0x103   :  { %v1263_v0 = vpop.f32.mrf.mxu0 }
 0x104   :  { %v1285_v1 = vpop.f32.mrf.mxu1 }
 0x105   :  { %v1264_v2 = vpop.f32.mrf.mxu0 }
 0x106   :  { %v1265_v7 = vadd.f32 %v1264_v2, %v1263_v0  ;;  %v1286_v8 = vpop.f32.mrf.mxu1 }
 0x107   :  { %v1266_v9 = vpop.f32.mrf.mxu0  ;;  %v1287_v12 = vadd.f32 %v1286_v8, %v1285_v1  ;;  %v920_v1 = vshrl.u32 %v918_v58, 1 }
 0x108   :  { %v698_v11 = vadd.f32 %v1265_v7, %v657_v5  ;;  %v1288_v13 = vpop.f32.mrf.mxu1 }
 0x109   :  { %v1267_v14 = vpop.f32.mrf.mxu0  ;;  %vm922_vm9 = vcmp.lt.s32.totalorder %v920_v1, 1503238553 }
 0x10a   :  { %v739_v18 = vadd.f32 %v1287_v12, %v698_v11  ;;  %v1268_v19 = vadd.f32 %v1267_v14, %v1266_v9  ;;  %v1289_v20 = vpop.f32.mrf.mxu1  ;;  %v1020_v11 = vadd.s32 %v1019_v10, %v1764_v40  ;;  %v1021_v12 = vadd.s32 %v1019_v10, %v1766_v41 }
 0x10b   :  { %v1290_v23 = vadd.f32 %v1289_v20, %v1288_v13 }
 0x10c   :  { %v747_v21 = vmul.f32 0.2, %v739_v18  ;;  %v701_v22 = vadd.f32 %v1268_v19, %v660_v17  ;;  %vm745_vm1 = vcmp.ge.f32.partialorder %v739_v18, 0.0  ;;  %v1022_v13 = vshrl.u32 %v1020_v11, 16 }
 0x10d   :  { %v1023_v14 = vshrl.u32 %v1021_v12, 16 }
 0x10e   :  { %v742_v27 = vadd.f32 %v1290_v23, %v701_v22  ;;  %v749_v28 = vsel %vm745_vm1, %v739_v18, %v747_v21  ;;  %v1024_v15 = vxor.u32 %v1022_v13, %v1020_v11  ;;  %v1195_v22 = vld [vmem:[%s1818_s7] ss:$0 sm:$0xff] }
 0x10f   :  { %v782_v31 = vmul.f32 1.4285715, %v749_v28  ;;  %v1025_v16 = vxor.u32 %v1023_v14, %v1021_v12 }
 0x110   :  { %vm746_vm2 = vcmp.ge.f32.partialorder %v742_v27, 0.0  ;;  %v748_v29 = vmul.f32 0.2, %v742_v27  ;;  %v1026_v17 = vmul.u32 2146121005, %v1024_v15 }
 0x111   :  { %v1027_v18 = vmul.u32 2146121005, %v1025_v16 }
 0x112   :  { %v750_v30 = vsel %vm746_vm2, %v742_v27, %v748_v29  ;;  %v1028_v19 = vshrl.u32 %v1026_v17, 15 }
 0x113   :  { %v783_v32 = vmul.f32 1.4285715, %v750_v30  ;;  %v1029_v20 = vshrl.u32 %v1027_v18, 15 }
 0x114   :  { %v1030_v21 = vxor.u32 %v1028_v19, %v1026_v17 }
 0x115   :  { %v1193_v33 = vpack.c.bf16 %v783_v32, %v782_v31  ;;  %v1031_v26 = vxor.u32 %v1029_v20, %v1027_v18 }
 0x116   :  { %v1032_v27 = vshrl.u32 %v1030_v21, 1 }
 0x117   :  { %1322 = vmatmul.mubr.msk.bf16.vlgmr.msra.gmra.mxu0 %vm1192_vm5, %v1193_v33  ;;  %v1033_v31 = vshrl.u32 %v1031_v26, 1 }
 0x118   :  { %vm1034_vm12 = vcmp.lt.s32.totalorder %v1032_v27, 1503238553 }
 0x119   :  { %vm1035_vm14 = vcmp.lt.s32.totalorder %v1033_v31, 1503238553 }
 0x162   :  { %v1099_v45 = vpop.permute.xlu0 %1098 }
 0x1d7   :  { %v892_v55 = vpop.f32.mrf.mxu0 }
 0x1d8   :  { %v893_v56 = vadd.f32 %v1183_v54, %v892_v55 }
 0x1d9   :  { %v1323_v59 = vpop.f32.mrf.mxu0 }
 0x1da   :  { %vm899_vm6 = vcmp.ge.f32.partialorder %v893_v56, 0.0  ;;  %v901_v60 = vmul.f32 0.2, %v893_v56  ;;  %v1103_v59 = vsub.s32 0, %v1754_v34 }
 0x1db   :  { %v895_v61 = vpop.f32.mrf.mxu0 }
 0x1dc   :  { %v903_v62 = vsel %vm899_vm6, %v893_v56, %v901_v60  ;;  %v896_v0 = vadd.f32 %v1183_v54, %v895_v61 }
 0x1dd   :  { %v1324_v2 = vpop.f32.mrf.mxu0  ;;  %v923_v4 = vmul.f32 1.4285715, %v903_v62  ;;  %v1104_v62 = vrot.slane %v1099_v45, %v1103_v59 }
 0x1de   :  { %vm900_vm7 = vcmp.ge.f32.partialorder %v896_v0, 0.0  ;;  %v902_v3 = vmul.f32 0.2, %v896_v0 }
 0x1df   :  { %v925_v7 = vsel %vm921_vm8, %v923_v4, 0.0 }
 0x1e0   :  { %v904_v5 = vsel %vm900_vm7, %v896_v0, %v902_v3 }
 0x1e1   :  { %v924_v6 = vmul.f32 1.4285715, %v904_v5 }
 0x1e3   :  { %v926_v8 = vsel %vm922_vm9, %v924_v6, 0.0 }
 0x1e4   :  { %v927_v9 = vpack.c.bf16 %v926_v8, %v925_v7 }
 0x1e6   :  { %1334 = vmatmul.mubr.msk.bf16.vlgmr.msra.gmra.mxu1 %vm967_vm10, %v927_v9 }
 0x2a6   :  { %v1005_v23 = vpop.f32.mrf.mxu1 }
 0x2a7   :  { %v1006_v25 = vadd.f32 %v1195_v22, %v1005_v23 }
 0x2a8   :  { %v1335_v40 = vpop.f32.mrf.mxu1 }
 0x2a9   :  { %vm1012_vm11 = vcmp.ge.f32.partialorder %v1006_v25, 0.0  ;;  %v1014_v41 = vmul.f32 0.2, %v1006_v25 }
 0x2aa   :  { %v1008_v28 = vpop.f32.mrf.mxu1 }
 0x2ab   :  { %v1016_v29 = vsel %vm1012_vm11, %v1006_v25, %v1014_v41  ;;  %v1009_v30 = vadd.f32 %v1195_v22, %v1008_v28 }
 0x2ac   :  { %v1036_v32 = vmul.f32 1.4285715, %v1016_v29  ;;  %v1336_v33 = vpop.f32.mrf.mxu1 }
 0x2ad   :  { %vm1013_vm13 = vcmp.ge.f32.partialorder %v1009_v30, 0.0  ;;  %v1015_v36 = vmul.f32 0.2, %v1009_v30 }
 0x2ae   :  { %v1038_v37 = vsel %vm1034_vm12, %v1036_v32, 0.0 }
 0x2af   :  { %v1017_v38 = vsel %vm1013_vm13, %v1009_v30, %v1015_v36  ;;  %v1047_v39 = vmul.f32 %v1201_v35, %v1038_v37 }
 0x2b0   :  { %v1037_v42 = vmul.f32 1.4285715, %v1017_v38 }
 0x2b1   :  { %1049 = vxpose.xlu0.b32.start [1/2] (short) (narrow) %v1047_v39, 32 }
 0x2b2   :  { %v1039_v43 = vsel %vm1035_vm14, %v1037_v42, 0.0 }
 0x2b3   :  { %v1048_v44 = vmul.f32 %v1201_v35, %v1039_v43 }
 0x2b5   :  { %1050 = vxpose.xlu0.b32.end [2/2] (short) (narrow) %v1048_v44, 32 }
 0x32d   :  { %v1065_v24 = vpop.trf.xlu0 }
 0x32e   :  { %v1082_v49 = vsel %vm1081_vm15, %v1065_v24, 0.0 }
 0x331   :  { %v1066_v46 = vpop.trf.xlu0 }
 0x332   :  { %v1083_v47 = vsel %vm1081_vm15, %v1066_v46, 0.0 }
 0x333   :  { %v1084_v51 = vadd.f32 %v1083_v47, %v1082_v49 }
 0x335   :  { %v1067_v48 = vpop.trf.xlu0 }
 0x336   :  { %v1085_v50 = vsel %vm1081_vm15, %v1067_v48, 0.0 }
 0x337   :  { %v1086_v52 = vadd.f32 %v1085_v50, %v1084_v51 }
 0x339   :  { %v1068_v53 = vpop.trf.xlu0 }
 0x33a   :  { %v1087_v54 = vsel %vm1081_vm15, %v1068_v53, 0.0 }
 0x33b   :  { %v1088_v55 = vadd.f32 %v1087_v54, %v1086_v52 }
 0x33d   :  { %v1089_v56 = vrot.slane %v1088_v55, 4 }
 0x33f   :  { %v1090_v57 = vadd.f32 %v1089_v56, %v1088_v55 }
 0x341   :  { %v1091_v58 = vrot.slane %v1090_v57, 2 }
 0x343   :  { %v1092_v60 = vadd.f32 %v1091_v58, %v1090_v57 }
 0x345   :  { %v1093_v61 = vrot.slane %v1092_v60, 1 }
 0x347   :  { %v1094_v63 = vadd.f32 %v1093_v61, %v1092_v60 }
 0x349   :  { %v1105_v0 = vadd.f32 %v1104_v62, %v1094_v63 }
 0x34b   :  { %v1202_v1 = vmul.f32 -1.442695, %v1105_v0 }
 0x34d   :  { %1417 = vpow2.f32 %v1202_v1 }
 0x35a   :  { %v1418_v2 = vpop.eup %1417 }
 0x35b   :  { %v1109_v3 = vadd.f32 1.0, %v1418_v2 }
 0x35d   :  { %1419 = vrcp.f32 %v1109_v3 }
 0x36a   :  { %v1420_v4 = vpop.eup %1419 }
 0x36b   :  { %1113 = vst.msk [vmem:[%s1820_s10] sm:$0x1] %vm1112_vm0, %v1420_v4 }

</bundles_post_ra>
